<compile_context>
chip_gen: v7x
topology: tpu7x:2x2x1
jax: 0.10.0
libtpu: 0.0.40
codegen_flags: <defaults>
</compile_context>

<pallas_src>
import jax
import jax.numpy as jnp
from jax.experimental import pallas as pl
from jax.experimental.pallas import tpu as pltpu


def _round_up(x, m):
    return (x + m - 1) // m * m


def critic_kernel(x_ref, w1_ref, b1_ref, w2_ref, b2_ref, w3_ref, b3_ref, o_ref):
    # In-kernel cast to the weight dtype (no wrapper pass over x). No-op for
    # f32 weights; VPU cast for bf16 weights (full-rate bf16 MXU on v5e/v6e/v7x).
    x = x_ref[...].astype(w1_ref.dtype)

    # Layer 1: (TB, S) @ (S, L1) -> f32 acc; bias + ReLU in f32 on the VPU.
    h1 = jnp.dot(x, w1_ref[...], preferred_element_type=jnp.float32)
    h1 = jnp.maximum(h1 + b1_ref[...], 0.0)

    # Layer 2: (TB, L1) @ (L1, L2), activations cast to the weight dtype.
    h2 = jnp.dot(h1.astype(w2_ref.dtype), w2_ref[...],
                 preferred_element_type=jnp.float32)
    h2 = jnp.maximum(h2 + b2_ref[...], 0.0)

    # Output head, already transposed: w3 (1, L2) contracted against the last
    # axis of h2 (TB, L2) -> (1, TB).  Batch lands on lanes, so the store below
    # is a lane-dense row (no masked vst.msk partial stores, no per-row 4-byte
    # writeback DMA).
    out = jax.lax.dot_general(
        w3_ref[...], h2,
        dimension_numbers=(((1,), (1,)), ((), ())),
        preferred_element_type=jnp.float32,
    ) + b3_ref[...]

    o_ref[...] = out.astype(o_ref.dtype)


def critic_forward(x, params, *, block_b=1024):
    """x: (B, state_dim).  params: dict with (in, out)-layout matmul weights
    (optionally bf16), head weight w3 stored lane-dense as (1, latent2),
    f32 biases.  Returns (B, 1) float32."""
    w1, b1, w2, b2, w3, b3 = (
        params["w1"], params["b1"], params["w2"], params["b2"],
        params["w3"], params["b3"],
    )
    B, S = x.shape
    L1 = w1.shape[1]
    L2 = w2.shape[1]

    # --- batch tiling --------------------------------------------------------
    # Small batch: one full-array block (block dims == array dims is always a
    # legal tiling, no padding needed).  Larger batch: 128-aligned tiles (so
    # the (1, tb) output rows store unmasked), at least two tiles whenever
    # B > 128 so v7x's second TensorCore gets work, and a large default tile
    # (1024) to amortize per-grid-step overhead.  VMEM is nowhere near a
    # constraint on any generation at these sizes.
    if B <= 128:
        tb = B
    else:
        tb = max(128, min(block_b, _round_up(pl.cdiv(B, 2), 128)))
    num_tiles = pl.cdiv(B, tb)
    b_pad = num_tiles * tb  # only the *output* is (harmlessly) padded

    # Weights/biases stay VMEM-resident: full-array blocks, same block each step.
    def resident(a):
        return pl.BlockSpec(a.shape, lambda i: (0,) * a.ndim)

    flops = 2 * B * (S * L1 + L1 * L2 + L2)
    bytes_accessed = (
        x.size * x.dtype.itemsize
        + sum(a.size * a.dtype.itemsize for a in (w1, b1, w2, b2, w3, b3))
        + B * 4
    )

    out_row = pl.pallas_call(
        critic_kernel,
        out_shape=jax.ShapeDtypeStruct((1, b_pad), jnp.float32),
        grid=(num_tiles,),
        in_specs=[
            # x: tiled over batch; last block may be partial (OOB rows are
            # unspecified but only feed discarded output lanes).
            pl.BlockSpec((tb, S), lambda i: (i, 0)),
            resident(w1), resident(b1),
            resident(w2), resident(b2),
            resident(w3), resident(b3),
        ],
        # Lane-dense output: one (1, tb) row per grid step.
        out_specs=pl.BlockSpec((1, tb), lambda i: (0, i)),
        compiler_params=pltpu.CompilerParams(
            dimension_semantics=("parallel",),  # only matters on 2-TC v7x
        ),
        cost_estimate=pl.CostEstimate(
            flops=flops, transcendentals=0, bytes_accessed=bytes_accessed),
    )(x, w1, b1, w2, b2, w3, b3)

    if b_pad == B:
        return out_row.reshape(B, 1)          # free, contiguous reshape
    return out_row[0, :B].reshape(B, 1)       # tiny slice only when padded


def init_params(key, state_dim, latent1, latent2, *, matmul_dtype=jnp.float32):
    """Mirrors PyTorch nn.Linear default init U[-1/sqrt(fan_in), 1/sqrt(fan_in)].
    Matmul weights stored (in, out) in `matmul_dtype` (bf16 halves their HBM
    bytes on v5e/v6e/v7x alike); head weight stored lane-dense as (1, latent2);
    biases / head stay f32 (the f32 VPU path)."""
    ks = jax.random.split(key, 6)

    def linear(kw, kb, fan_in, fan_out):
        bound = 1.0 / float(fan_in) ** 0.5
        w = jax.random.uniform(kw, (fan_in, fan_out), jnp.float32, -bound, bound)
        b = jax.random.uniform(kb, (1, fan_out), jnp.float32, -bound, bound)
        return w, b

    w1, b1 = linear(ks[0], ks[1], state_dim, latent1)
    w2, b2 = linear(ks[2], ks[3], latent1, latent2)
    w3_col, b3 = linear(ks[4], ks[5], latent2, 1)
    return {
        "w1": w1.astype(matmul_dtype), "b1": b1,
        "w2": w2.astype(matmul_dtype), "b2": b2,
        "w3": w3_col.T, "b3": b3,                 # w3 lane-dense: (1, latent2)
    }


def critic_reference(x, p):
    h1 = jnp.maximum(x @ p["w1"].astype(jnp.float32) + p["b1"], 0.0)
    h2 = jnp.maximum(h1 @ p["w2"].astype(jnp.float32) + p["b2"], 0.0)
    return h2 @ p["w3"].T + p["b3"]


if __name__ == "__main__":
    # Shapes consistent with the module: args.state_dim=(16,), latent1=32,
    # latent2=64.
    STATE_DIM, LATENT1, LATENT2 = 16, 32, 64

    key = jax.random.PRNGKey(0)
    k_obs, k_obs2, k_params = jax.random.split(key, 3)
    params = init_params(k_params, STATE_DIM, LATENT1, LATENT2)

    # Small batch: single full-array tile.
    obs = jax.random.normal(k_obs, (8, STATE_DIM), jnp.float32)
    out = jax.block_until_ready(critic_forward(obs, params))
    ref = critic_reference(obs, params)
    assert out.shape == (8, 1), out.shape
    assert jnp.allclose(out, ref, atol=1e-5, rtol=1e-5), (
        f"max abs err {jnp.max(jnp.abs(out - ref))}")

    # Larger batch: exercises multi-tile grid + partial last block (no jnp.pad).
    obs2 = jax.random.normal(k_obs2, (300, STATE_DIM), jnp.float32)
    out2 = jax.block_until_ready(critic_forward(obs2, params))
    ref2 = critic_reference(obs2, params)
    assert out2.shape == (300, 1), out2.shape
    assert jnp.allclose(out2, ref2, atol=1e-5, rtol=1e-5), (
        f"max abs err {jnp.max(jnp.abs(out2 - ref2))}")

    # bf16 matmul-weight path (valid on v5e/v6e/v7x); loose tolerance since
    # layer inputs are quantized to bf16.
    params_bf16 = init_params(k_params, STATE_DIM, LATENT1, LATENT2,
                              matmul_dtype=jnp.bfloat16)
    out3 = jax.block_until_ready(critic_forward(obs2, params_bf16))
    assert out3.shape == (300, 1), out3.shape
    assert jnp.allclose(out3, ref2, atol=1e-1, rtol=1e-1), (
        f"max abs err {jnp.max(jnp.abs(out3 - ref2))}")

    print("KERNEL_OK")
</pallas_src>

<mosaic_0001>
module attributes {stable_mosaic.version = 11 : i64} {
  func.func @critic_kernel(%arg0: i32, %arg1: memref<8x16xf32, #tpu.memory_space<vmem>>, %arg2: memref<16x32xf32, #tpu.memory_space<vmem>>, %arg3: memref<1x32xf32, #tpu.memory_space<vmem>>, %arg4: memref<32x64xf32, #tpu.memory_space<vmem>>, %arg5: memref<1x64xf32, #tpu.memory_space<vmem>>, %arg6: memref<1x64xf32, #tpu.memory_space<vmem>>, %arg7: memref<1x1xf32, #tpu.memory_space<vmem>>, %arg8: memref<1x8xf32, #tpu.memory_space<vmem>>) attributes {dimension_semantics = [#tpu.dimension_semantics<parallel>], iteration_bounds = array<i64: 1>, scalar_prefetch = 0 : i64, scratch_operands = 0 : i64, tpu.core_type = #tpu.core_type<tc>, window_params = [{transform_indices = @transform_0, window_bounds = array<i64: 8, 16>}, {pipeline_mode = #tpu.pipeline_mode<synchronous>, transform_indices = @transform_1, window_bounds = array<i64: 16, 32>}, {pipeline_mode = #tpu.pipeline_mode<synchronous>, transform_indices = @transform_2, window_bounds = array<i64: 1, 32>}, {pipeline_mode = #tpu.pipeline_mode<synchronous>, transform_indices = @transform_3, window_bounds = array<i64: 32, 64>}, {pipeline_mode = #tpu.pipeline_mode<synchronous>, transform_indices = @transform_4, window_bounds = array<i64: 1, 64>}, {pipeline_mode = #tpu.pipeline_mode<synchronous>, transform_indices = @transform_5, window_bounds = array<i64: 1, 64>}, {pipeline_mode = #tpu.pipeline_mode<synchronous>, transform_indices = @transform_6, window_bounds = array<i64: 1, 1>}, {transform_indices = @transform_7, window_bounds = array<i64: 1, 8>}]} {
    %c0 = arith.constant 0 : index
    %c0_0 = arith.constant 0 : index
    %0 = vector.load %arg1[%c0, %c0_0] : memref<8x16xf32, #tpu.memory_space<vmem>>, vector<8x16xf32>
    %c0_1 = arith.constant 0 : index
    %c0_2 = arith.constant 0 : index
    %1 = vector.load %arg2[%c0_1, %c0_2] : memref<16x32xf32, #tpu.memory_space<vmem>>, vector<16x32xf32>
    %cst = arith.constant dense<0.000000e+00> : vector<8x32xf32>
    %2 = tpu.matmul %0, %1, %cst {dimension_numbers = #tpu.dot_dimension_numbers<[1], [0], [0], [1], [0, 0, 1, 1], [], []>} : vector<8x16xf32>, vector<16x32xf32>, vector<8x32xf32> -> vector<8x32xf32>
    %c0_3 = arith.constant 0 : index
    %c0_4 = arith.constant 0 : index
    %3 = vector.load %arg3[%c0_3, %c0_4] : memref<1x32xf32, #tpu.memory_space<vmem>>, vector<1x32xf32>
    %4 = vector.broadcast %3 : vector<1x32xf32> to vector<8x32xf32>
    %5 = arith.addf %2, %4 : vector<8x32xf32>
    %cst_5 = arith.constant 0.000000e+00 : f32
    %6 = vector.broadcast %cst_5 : f32 to vector<8x32xf32>
    %7 = arith.maximumf %5, %6 : vector<8x32xf32>
    %c0_6 = arith.constant 0 : index
    %c0_7 = arith.constant 0 : index
    %8 = vector.load %arg4[%c0_6, %c0_7] : memref<32x64xf32, #tpu.memory_space<vmem>>, vector<32x64xf32>
    %cst_8 = arith.constant dense<0.000000e+00> : vector<8x64xf32>
    %9 = tpu.matmul %7, %8, %cst_8 {dimension_numbers = #tpu.dot_dimension_numbers<[1], [0], [0], [1], [0, 0, 1, 1], [], []>} : vector<8x32xf32>, vector<32x64xf32>, vector<8x64xf32> -> vector<8x64xf32>
    %c0_9 = arith.constant 0 : index
    %c0_10 = arith.constant 0 : index
    %10 = vector.load %arg5[%c0_9, %c0_10] : memref<1x64xf32, #tpu.memory_space<vmem>>, vector<1x64xf32>
    %11 = vector.broadcast %10 : vector<1x64xf32> to vector<8x64xf32>
    %12 = arith.addf %9, %11 : vector<8x64xf32>
    %cst_11 = arith.constant 0.000000e+00 : f32
    %13 = vector.broadcast %cst_11 : f32 to vector<8x64xf32>
    %14 = arith.maximumf %12, %13 : vector<8x64xf32>
    %c0_12 = arith.constant 0 : index
    %c0_13 = arith.constant 0 : index
    %15 = vector.load %arg6[%c0_12, %c0_13] : memref<1x64xf32, #tpu.memory_space<vmem>>, vector<1x64xf32>
    %cst_14 = arith.constant dense<0.000000e+00> : vector<1x8xf32>
    %16 = tpu.matmul %15, %14, %cst_14 {dimension_numbers = #tpu.dot_dimension_numbers<[1], [1], [0], [0], [0, 0, 1, 0], [], []>} : vector<1x64xf32>, vector<8x64xf32>, vector<1x8xf32> -> vector<1x8xf32>
    %c0_15 = arith.constant 0 : index
    %c0_16 = arith.constant 0 : index
    %17 = vector.load %arg7[%c0_15, %c0_16] : memref<1x1xf32, #tpu.memory_space<vmem>>, vector<1x1xf32>
    %18 = vector.broadcast %17 : vector<1x1xf32> to vector<1x8xf32>
    %19 = arith.addf %16, %18 : vector<1x8xf32>
    %c0_17 = arith.constant 0 : index
    %c0_18 = arith.constant 0 : index
    %20 = vector.load %arg8[%c0_17, %c0_18] : memref<1x8xf32, #tpu.memory_space<vmem>>, vector<1x8xf32>
    tpu.vector_store %arg8[%c0_17, %c0_18], %19 {strides = array<i32>} : memref<1x8xf32, #tpu.memory_space<vmem>>, vector<1x8xf32>,
    return
  }
  func.func @transform_0(%arg0: i32) -> (i32, i32) {
    %c0_i32 = arith.constant 0 : i32
    %c0_i32_0 = arith.constant 0 : i32
    return %arg0, %c0_i32 : i32, i32
  }
  func.func @transform_1(%arg0: i32) -> (i32, i32) {
    %c0_i32 = arith.constant 0 : i32
    %c0_i32_0 = arith.constant 0 : i32
    %c0_i32_1 = arith.constant 0 : i32
    return %c0_i32, %c0_i32_0 : i32, i32
  }
  func.func @transform_2(%arg0: i32) -> (i32, i32) {
    %c0_i32 = arith.constant 0 : i32
    %c0_i32_0 = arith.constant 0 : i32
    %c0_i32_1 = arith.constant 0 : i32
    return %c0_i32, %c0_i32_0 : i32, i32
  }
  func.func @transform_3(%arg0: i32) -> (i32, i32) {
    %c0_i32 = arith.constant 0 : i32
    %c0_i32_0 = arith.constant 0 : i32
    %c0_i32_1 = arith.constant 0 : i32
    return %c0_i32, %c0_i32_0 : i32, i32
  }
  func.func @transform_4(%arg0: i32) -> (i32, i32) {
    %c0_i32 = arith.constant 0 : i32
    %c0_i32_0 = arith.constant 0 : i32
    %c0_i32_1 = arith.constant 0 : i32
    return %c0_i32, %c0_i32_0 : i32, i32
  }
  func.func @transform_5(%arg0: i32) -> (i32, i32) {
    %c0_i32 = arith.constant 0 : i32
    %c0_i32_0 = arith.constant 0 : i32
    %c0_i32_1 = arith.constant 0 : i32
    return %c0_i32, %c0_i32_0 : i32, i32
  }
  func.func @transform_6(%arg0: i32) -> (i32, i32) {
    %c0_i32 = arith.constant 0 : i32
    %c0_i32_0 = arith.constant 0 : i32
    %c0_i32_1 = arith.constant 0 : i32
    return %c0_i32, %c0_i32_0 : i32, i32
  }
  func.func @transform_7(%arg0: i32) -> (i32, i32) {
    %c0_i32 = arith.constant 0 : i32
    %c0_i32_0 = arith.constant 0 : i32
    return %c0_i32, %arg0 : i32, i32
  }
}

</mosaic_0001>

<bundles_post_ra>
// kernel: tpu_custom_call.1
= control target key start
LH: loop header
LB: loop body
LE: loop exit
PB: predicated region body
PF: predicated region fallthrough
CT: control target
= control target key end

     0   :  { %s617_s0 = inlined_call_operand.hbm [shape: f32[8,16], index: 0, kind: input, shape index: {}]   ;;  %s618_s1 = inlined_call_operand.hbm [shape: f32[16,32], index: 1, kind: input, shape index: {}]   ;;  %s619_s2 = inlined_call_operand.vmem [shape: f32[1,32], index: 2, kind: input, shape index: {}]   ;;  %s620_s3 = inlined_call_operand.hbm [shape: f32[32,64], index: 3, kind: input, shape index: {}]   ;;  %s621_s4 = inlined_call_operand.vmem [shape: f32[1,64], index: 4, kind: input, shape index: {}]   ;;  %s622_s5 = inlined_call_operand.vmem [shape: f32[1,64], index: 5, kind: input, shape index: {}]   ;;  %s623_s6 = inlined_call_operand.<no memory space> [shape: f32[1,1], index: 6, kind: input, shape index: {}]   ;;  %s624_s7 = inlined_call_operand.hbm [shape: f32[1,8], index: 7, kind: output, shape index: {}]  }
   0x1   :  { %v12_v0 = vstv %s623_s6 }
   0x2   :  { %13 = vst [vmem:[#allocation2] sm:$0x1] %v12_v0 }
   0x3   :  { %14 = vsyncpa [#allocation4], 0 }
   0x4   :  { %15 = vsyncpa [#allocation7], 0 }
   0x5   :  { %16 = vsyncpa [#allocation5], 0  ;;  %s498_s26 = smov [#allocation6]   ;;  %s404_s30 = scalar_lea.hbm %s618_s1, 256 }
   0x6   :  { %s32_s27 = sshll.u32 %s498_s26, 4  ;;  %p405_p0 = scmp.ne.s32.totalorder %s618_s1, %s404_s30  ;;  %s33_s27 = int_to_ptr.vmem [resolvable:$true] %s32_s27 }
   0x7   :  { %p408_p1 = scmp.lt.u32.totalorder %s404_s30, %s618_s1 }
   0x9   :  { %p410_p2 = pnand %p408_p1, %p405_p0 }
   0xb   :  { %413 = shalt.err (!%p410_p2)
}
   0xc   :  { %s414_s6 = scalar_lea.vmem %s33_s27, 256  ;;  %p419_p4 = scmp.lt.s32.totalorder %s33_s27, %s33_s27 }
   0xd   :  { %p415_p3 = scmp.ne.s32.totalorder %s33_s27, %s414_s6  ;;  %p420_p5 = scmp.lt.s32.totalorder %s414_s6, %s414_s6 }
   0xf   :  { %p421_p6 = por %p420_p5, %p419_p4 }
  0x11   :  { %p422_p7 = pnand %p421_p6, %p415_p3 }
  0x13   :  { %425 = shalt.err (!%p422_p7)
}
  0x14   :  { %s499_s12 = smov 128   ;;  %s500_s13 = smov 8  }
  0x15   :  { %38 = dma.hbm_to_vmem [thread:$0]  %s618_s1, 256, %s33_s27, [#allocation7], %s499_s12, %s499_s12, %s500_s13  }
  0x16   :  { %s501_s16 = smov [#allocation3]   ;;  %s502_s18 = smov [#allocation8]  }
  0x17   :  { %s23_s17 = sshll.u32 %s501_s16, 4  ;;  %s46_s19 = sshll.u32 %s502_s18, 4  ;;  %s24_s17 = int_to_ptr.vmem [resolvable:$true] %s23_s17  ;;  %s47_s19 = int_to_ptr.vmem [resolvable:$true] %s46_s19 }
  0x18   :  { %s426_s22 = scalar_lea.hbm %s617_s0, 128 }
  0x19   :  { %p427_p8 = scmp.ne.s32.totalorder %s617_s0, %s426_s22  ;;  %p430_p9 = scmp.lt.u32.totalorder %s426_s22, %s617_s0 }
  0x1b   :  { %p432_p10 = pnand %p430_p9, %p427_p8 }
  0x1d   :  { %435 = shalt.err (!%p432_p10)
}
  0x1e   :  { %s436_s1 = scalar_lea.vmem %s24_s17, 128  ;;  %p441_p12 = scmp.lt.s32.totalorder %s24_s17, %s24_s17 }
  0x1f   :  { %p437_p11 = scmp.ne.s32.totalorder %s24_s17, %s436_s1  ;;  %p442_p13 = scmp.lt.s32.totalorder %s436_s1, %s436_s1 }
  0x21   :  { %p443_p0 = por %p442_p13, %p441_p12 }
  0x23   :  { %p444_p1 = pnand %p443_p0, %p437_p11 }
  0x25   :  { %447 = shalt.err (!%p444_p1)
}
  0x26   :  { %26 = dma.hbm_to_vmem [thread:$0]  %s617_s0, 128, %s24_s17, [#allocation4]  }
  0x27   :  { %s448_s8 = scalar_lea.hbm %s620_s3, 512 }
  0x28   :  { %p449_p2 = scmp.ne.s32.totalorder %s620_s3, %s448_s8  ;;  %p452_p3 = scmp.lt.u32.totalorder %s448_s8, %s620_s3 }
  0x2a   :  { %p454_p4 = pnand %p452_p3, %p449_p2 }
  0x2c   :  { %457 = shalt.err (!%p454_p4)
}
  0x2d   :  { %s458_s14 = scalar_lea.vmem %s47_s19, 512  ;;  %p463_p6 = scmp.lt.s32.totalorder %s47_s19, %s47_s19 }
  0x2e   :  { %p459_p5 = scmp.ne.s32.totalorder %s47_s19, %s458_s14  ;;  %p464_p7 = scmp.lt.s32.totalorder %s458_s14, %s458_s14 }
  0x30   :  { %p465_p8 = por %p464_p7, %p463_p6 }
  0x32   :  { %p466_p9 = pnand %p465_p8, %p459_p5 }
  0x34   :  { %469 = shalt.err (!%p466_p9)
}
  0x35   :  { %52 = dma.hbm_to_vmem [thread:$0]  %s620_s3, 512, %s47_s19, [#allocation7], %s499_s12, %s499_s12, %s500_s13  }
  0x36   :  { %492 = dma.done.wait [#allocation4], 128  }
  0x37   :  { %493 = vsyncadd [#allocation4], 4294967168 }
  0x38   :  { %494 = dma.done.wait [#allocation7], 768  }
  0x39   :  { %495 = vsyncadd [#allocation7], 4294966528  ;;  %v503_v1 = vmov 0.0|0.0   ;;  %vm504_vm0 = vmmov 0   ;;  %v505_v2 = vmov 0.0   ;;  %v69_v3 = vld [vmem:[#allocation6] sm:$0xff]  ;;  %v246_v26 = vlaneseq }
  0x3a   :  { %384 = vmatprep.subr.bf16.mxu0 %v503_v1  ;;  %365 = vmatprep.mubr.msk.f32.mxu0 %vm504_vm0, %v505_v2  ;;  %v70_v4 = vld [vmem:[#allocation6 + $0x8] sm:$0xff]  ;;  %v153_v6 = vld [vmem:[#allocation8] sm:$0xff]  ;;  %v154_v7 = vld [vmem:[#allocation8 + $0x8] sm:$0xff]  ;;  %vm78_vm1 = vcmask 130048   ;;  %vm164_vm2 = vcmask 261120   ;;  %v506_v19 = vmov 0  }
  0x3b   :  { %387 = vmatprep.subr.bf16.mxu1 %v503_v1  ;;  %376 = vmatprep.mubr.msk.f32.mxu1 %vm504_vm0, %v505_v2  ;;  %v385_v5 = vpack.c.bf16 %v70_v4, %v69_v3  ;;  %v388_v8 = vpack.c.bf16 %v154_v7, %v153_v6  ;;  %v68_v9 = vld [vmem:[#allocation3] sm:$0xff]  ;;  %v155_v10 = vld [vmem:[#allocation8 + $0x10] sm:$0xff]  ;;  %v156_v11 = vld [vmem:[#allocation8 + $0x18] sm:$0xff]  ;;  %vm250_vm3 = vcmask 523264   ;;  %v247_v27 = vshrl.u32 %v246_v26, 7  ;;  %s507_s18 = smov [#allocation9]  }
  0x3c   :  { %v391_v12 = vpack.c.bf16 %v156_v11, %v155_v10  ;;  %v345_v13 = vld [vmem:[%s619_s2] ss:$0 sm:$0xff]  ;;  %403 = vset.pattern.permute.xlu0 %v506_v19  ;;  %s335_s19 = sshll.u32 %s507_s18, 4  ;;  %vm327_vm4 = vcmask 57344   ;;  %s336_s19 = int_to_ptr.vmem [resolvable:$true] %s335_s19 }
  0x3d   :  { %386 = vmatpush3.bf16.msra.mxu0 %v385_v5  ;;  %389 = vmatpush3.bf16.msra.mxu1 %v388_v8  ;;  %v240_v18 = vld [vmem:[#allocation2] sm:$0x1]  ;;  %v248_v28 = vsub.s32 0, %v247_v27  ;;  %s474_s20 = scalar_lea.vmem %s336_s19, 32  ;;  %p475_p11 = scmp.lt.s32.totalorder %s336_s19, %s336_s19 }
  0x3e   :  { %379 = vmatprep.subr.mxu0 %v505_v2  ;;  %390 = vmatprep.subr.bf16.mxu1 %v503_v1  ;;  %v347_v20 = vld [vmem:[%s621_s4] ss:$0 sm:$0xff]  ;;  %s470_s4 = scalar_lea.vmem %s336_s19, 16 }
  0x3f   :  { %243 = vperm.xlu0 %403, %v240_v18   ;;  %v239_v25 = vld [vmem:[%s622_s5] sm:$0x1]  ;;  %p471_p10 = scmp.ne.s32.totalorder %s336_s19, %s470_s4  ;;  %p476_p12 = scmp.lt.s32.totalorder %s474_s20, %s470_s4 }
  0x40   :  { %366 = vmatmul.mubr.msk.f32.vlgmr.msra.gmra.mrb[0].mxu0 %vm78_vm1, %v68_v9 }
  0x41   :  { %381 = vmatprep.mubr.msk.f32.mxu0 %vm504_vm0, %v505_v2  ;;  %392 = vmatpush3.bf16.msra.mxu1 %v391_v12  ;;  %p477_p13 = por %p476_p12, %p475_p11 }
  0x43   :  { %p478_p0 = pnand %p477_p13, %p471_p10 }
  0xbe   :  { %v244_v29 = vpop.permute.xlu0 %243 }
  0xbf   :  { %v249_v30 = vrot.slane %v244_v29, %v248_v28 }
 0x113   :  { %v148_v14 = vpop.f32.mrb[0].mxu0 }
 0x114   :  { %v149_v15 = vadd.f32 %v345_v13, %v148_v14  ;;  %v367_v16 = vpop.f32.mrb[1].mxu0 }
 0x116   :  { %v152_v17 = vmax.f32 %v149_v15, 0.0 }
 0x118   :  { %377 = vmatmul.mubr.msk.f32.vlgmr.msra.gmra.mrb[0].mxu1 %vm164_vm2, %v152_v17 }
 0x1eb   :  { %v234_v21 = vpop.f32.mrb[0].mxu1 }
 0x1ec   :  { %v235_v22 = vadd.f32 %v347_v20, %v234_v21  ;;  %v378_v23 = vpop.f32.mrb[1].mxu1 }
 0x1ee   :  { %v238_v24 = vmax.f32 %v235_v22, 0.0 }
 0x1f0   :  { %380 = vmatpush3.xpose.msk.msra.mxu0 %vm250_vm3, %v238_v24 }
 0x1f3   :  { %382 = vmatmul.mubr.msk.f32.vlgmr.msra.gmra.mrb[2].mxu0 %vm250_vm3, %v239_v25 }
 0x2c6   :  { %v323_v31 = vpop.f32.mrb[2].mxu0 }
 0x2c7   :  { %v324_v32 = vadd.f32 %v323_v31, %v249_v30  ;;  %v383_v33 = vpop.f32.mrb[3].mxu0 }
 0x2c9   :  { %328 = vst.msk [vmem:[#allocation9] sm:$0x1] %vm327_vm4, %v324_v32 }
 0x2ca   :  { %481 = shalt.err (!%p478_p0)
}
 0x2cb   :  { %s482_s22 = scalar_lea.hbm %s624_s7, 16 }
 0x2cc   :  { %p483_p1 = scmp.ne.s32.totalorder %s624_s7, %s482_s22  ;;  %p486_p2 = scmp.lt.u32.totalorder %s482_s22, %s624_s7 }
 0x2ce   :  { %p488_p3 = pnand %p486_p2, %p483_p1 }
 0x2d0   :  { %491 = shalt.err (!%p488_p3)
}
 0x2d1   :  { %338 = dma.vmem_to_hbm [thread:$0]  %s336_s19, 16, %s624_s7, [#allocation5]  }
 0x2d2   :  { %496 = dma.done.wait [#allocation5], 16  }
 0x2d3   :  { %497 = vsyncadd [#allocation5], 4294967280 }
 0x2d4   :  { %342 = vsyncpa [#allocation4], 1 }
 0x2d5   :  { %343 = vsyncpa [#allocation7], 1 }
 0x2d6   :  { %344 = vsyncpa [#allocation5], 1 }

</bundles_post_ra>
